<compile_context>
chip_gen: v5e
topology: v5e:2x2
jax: 0.10.0
libtpu: 0.0.40
codegen_flags: <defaults>
</compile_context>

<pallas_src>
import functools

import jax
import jax.numpy as jnp
from jax.experimental import pallas as pl
from jax.experimental.pallas import tpu as pltpu

LANE = 128     # vreg lane width
SUBLANE = 8    # f32 sublane count


def _round_up(n, m):
    return ((n + m - 1) // m) * m


def tuple_net_kernel(x_ref, w1_ref, b1_ref, w2_ref, b2_ref, y_ref):
    # One fused MLP evaluation; both tuple elements derive from the same y.
    # (Valid because Net is deterministic — no dropout / stochastic layers.)
    x = x_ref[...]
    h = jnp.dot(x, w1_ref[...], preferred_element_type=jnp.float32) + b1_ref[...]
    h = jnp.maximum(h, 0.0)                      # ReLU on the VPU (free filler)
    y = jnp.dot(h, w2_ref[...], preferred_element_type=jnp.float32) + b2_ref[...]
    # Single lane-dense merged output: [ y | 2*y ] -> unmasked full-lane stores.
    y_ref[...] = jnp.concatenate([y, 2.0 * y], axis=-1).astype(y_ref.dtype)


@functools.partial(jax.jit, static_argnames=("tm",))
def tuple_returning_net(x, w1, b1, w2, b2, *, tm=512):
    batch, in_f = x.shape
    hidden = w1.shape[1]
    out_f = w2.shape[1]

    # Pad every lane (last) dim to 128 so MXU operands and stores are dense.
    in_p = _round_up(in_f, LANE)
    hid_p = _round_up(hidden, LANE)
    out_p = _round_up(out_f, LANE)

    # Batch tile: 512 rows by default; clamp (and sublane-align) for tiny batches.
    tm = min(tm, _round_up(batch, SUBLANE))
    batch_p = _round_up(batch, tm)

    xp = jnp.pad(x, ((0, batch_p - batch), (0, in_p - in_f)))
    w1p = jnp.pad(w1, ((0, in_p - in_f), (0, hid_p - hidden)))
    b1p = jnp.pad(b1, ((0, 0), (0, hid_p - hidden)))
    w2p = jnp.pad(w2, ((0, hid_p - hidden), (0, out_p - out_f)))
    b2p = jnp.pad(b2, ((0, 0), (0, out_p - out_f)))

    flops = 2 * batch_p * (in_p * hid_p + hid_p * out_p)
    bytes_accessed = 4 * (xp.size + w1p.size + b1p.size + w2p.size + b2p.size
                          + batch_p * 2 * out_p)

    merged = pl.pallas_call(
        tuple_net_kernel,
        out_shape=jax.ShapeDtypeStruct((batch_p, 2 * out_p), jnp.float32),
        grid=(batch_p // tm,),
        in_specs=[
            pl.BlockSpec((tm, in_p), lambda i: (i, 0)),      # x: tiled over batch
            pl.BlockSpec((in_p, hid_p), lambda i: (0, 0)),   # W1: resident
            pl.BlockSpec((1, hid_p), lambda i: (0, 0)),      # b1: resident
            pl.BlockSpec((hid_p, out_p), lambda i: (0, 0)),  # W2: resident
            pl.BlockSpec((1, out_p), lambda i: (0, 0)),      # b2: resident
        ],
        out_specs=pl.BlockSpec((tm, 2 * out_p), lambda i: (i, 0)),
        compiler_params=pltpu.CompilerParams(
            dimension_semantics=("parallel",)),              # shards across TCs on v7x
        cost_estimate=pl.CostEstimate(
            flops=flops, transcendentals=0, bytes_accessed=bytes_accessed),
    )(xp, w1p, b1p, w2p, b2p)

    # Split the merged lane-dense buffer back into the tuple (free XLA slices).
    y1 = merged[:batch, :out_f]
    y2 = merged[:batch, out_p:out_p + out_f]
    return y1, y2


if __name__ == "__main__":
    # Small shapes consistent with a tiny MLP Net: batch=8, in=32, hidden=64, out=16.
    batch, in_features, hidden, out_features = 8, 32, 64, 16

    key = jax.random.PRNGKey(0)
    kx, kw1, kb1, kw2, kb2 = jax.random.split(key, 5)

    x = jax.random.normal(kx, (batch, in_features), dtype=jnp.float32)
    # Deterministic synthetic parameters ((in, out) layout, biases as (1, F)).
    w1 = jax.random.normal(kw1, (in_features, hidden), dtype=jnp.float32) * 0.1
    b1 = jax.random.normal(kb1, (1, hidden), dtype=jnp.float32) * 0.1
    w2 = jax.random.normal(kw2, (hidden, out_features), dtype=jnp.float32) * 0.1
    b2 = jax.random.normal(kb2, (1, out_features), dtype=jnp.float32) * 0.1

    y1, y2 = tuple_returning_net(x, w1, b1, w2, b2)
    jax.block_until_ready((y1, y2))

    # Correctness check against a pure-JAX reference of the same forward pass.
    ref = jnp.maximum(x @ w1 + b1, 0.0) @ w2 + b2
    assert jnp.allclose(y1, ref, atol=1e-5), "first tuple element mismatch"
    assert jnp.allclose(y2, 2.0 * ref, atol=1e-5), "second tuple element mismatch"

    print("KERNEL_OK")
</pallas_src>

<mosaic_0001>
module attributes {stable_mosaic.version = 11 : i64} {
  func.func @tuple_net_kernel(%arg0: i32, %arg1: memref<8x128xf32, #tpu.memory_space<vmem>>, %arg2: memref<128x128xf32, #tpu.memory_space<vmem>>, %arg3: memref<1x128xf32, #tpu.memory_space<vmem>>, %arg4: memref<128x128xf32, #tpu.memory_space<vmem>>, %arg5: memref<1x128xf32, #tpu.memory_space<vmem>>, %arg6: memref<8x256xf32, #tpu.memory_space<vmem>>) attributes {dimension_semantics = [#tpu.dimension_semantics<parallel>], iteration_bounds = array<i64: 1>, scalar_prefetch = 0 : i64, scratch_operands = 0 : i64, tpu.core_type = #tpu.core_type<tc>, window_params = [{transform_indices = @transform_0, window_bounds = array<i64: 8, 128>}, {pipeline_mode = #tpu.pipeline_mode<synchronous>, transform_indices = @transform_1, window_bounds = array<i64: 128, 128>}, {pipeline_mode = #tpu.pipeline_mode<synchronous>, transform_indices = @transform_2, window_bounds = array<i64: 1, 128>}, {pipeline_mode = #tpu.pipeline_mode<synchronous>, transform_indices = @transform_3, window_bounds = array<i64: 128, 128>}, {pipeline_mode = #tpu.pipeline_mode<synchronous>, transform_indices = @transform_4, window_bounds = array<i64: 1, 128>}, {transform_indices = @transform_5, window_bounds = array<i64: 8, 256>}]} {
    %c0 = arith.constant 0 : index
    %c0_0 = arith.constant 0 : index
    %0 = vector.load %arg1[%c0, %c0_0] : memref<8x128xf32, #tpu.memory_space<vmem>>, vector<8x128xf32>
    %c0_1 = arith.constant 0 : index
    %c0_2 = arith.constant 0 : index
    %1 = vector.load %arg2[%c0_1, %c0_2] : memref<128x128xf32, #tpu.memory_space<vmem>>, vector<128x128xf32>
    %cst = arith.constant dense<0.000000e+00> : vector<8x128xf32>
    %2 = tpu.matmul %0, %1, %cst {dimension_numbers = #tpu.dot_dimension_numbers<[1], [0], [0], [1], [0, 0, 1, 1], [], []>} : vector<8x128xf32>, vector<128x128xf32>, vector<8x128xf32> -> vector<8x128xf32>
    %c0_3 = arith.constant 0 : index
    %c0_4 = arith.constant 0 : index
    %3 = vector.load %arg3[%c0_3, %c0_4] : memref<1x128xf32, #tpu.memory_space<vmem>>, vector<1x128xf32>
    %4 = vector.broadcast %3 : vector<1x128xf32> to vector<8x128xf32>
    %5 = arith.addf %2, %4 : vector<8x128xf32>
    %cst_5 = arith.constant 0.000000e+00 : f32
    %6 = vector.broadcast %cst_5 : f32 to vector<8x128xf32>
    %7 = arith.maximumf %5, %6 : vector<8x128xf32>
    %c0_6 = arith.constant 0 : index
    %c0_7 = arith.constant 0 : index
    %8 = vector.load %arg4[%c0_6, %c0_7] : memref<128x128xf32, #tpu.memory_space<vmem>>, vector<128x128xf32>
    %cst_8 = arith.constant dense<0.000000e+00> : vector<8x128xf32>
    %9 = tpu.matmul %7, %8, %cst_8 {dimension_numbers = #tpu.dot_dimension_numbers<[1], [0], [0], [1], [0, 0, 1, 1], [], []>} : vector<8x128xf32>, vector<128x128xf32>, vector<8x128xf32> -> vector<8x128xf32>
    %c0_9 = arith.constant 0 : index
    %c0_10 = arith.constant 0 : index
    %10 = vector.load %arg5[%c0_9, %c0_10] : memref<1x128xf32, #tpu.memory_space<vmem>>, vector<1x128xf32>
    %11 = vector.broadcast %10 : vector<1x128xf32> to vector<8x128xf32>
    %12 = arith.addf %9, %11 : vector<8x128xf32>
    %cst_11 = arith.constant 2.000000e+00 : f32
    %13 = vector.broadcast %cst_11 : f32 to vector<8x128xf32>
    %14 = arith.mulf %13, %12 : vector<8x128xf32>
    %15 = tpu.concatenate %12, %14 in 1 : vector<8x128xf32>, vector<8x128xf32> -> vector<8x256xf32>
    %c0_12 = arith.constant 0 : index
    %c0_13 = arith.constant 0 : index
    %16 = vector.load %arg6[%c0_12, %c0_13] : memref<8x256xf32, #tpu.memory_space<vmem>>, vector<8x256xf32>
    tpu.vector_store %arg6[%c0_12, %c0_13], %15 {strides = array<i32>} : memref<8x256xf32, #tpu.memory_space<vmem>>, vector<8x256xf32>,
    return
  }
  func.func @transform_0(%arg0: i32) -> (i32, i32) {
    %c0_i32 = arith.constant 0 : i32
    %c0_i32_0 = arith.constant 0 : i32
    return %arg0, %c0_i32 : i32, i32
  }
  func.func @transform_1(%arg0: i32) -> (i32, i32) {
    %c0_i32 = arith.constant 0 : i32
    %c0_i32_0 = arith.constant 0 : i32
    %c0_i32_1 = arith.constant 0 : i32
    return %c0_i32, %c0_i32_0 : i32, i32
  }
  func.func @transform_2(%arg0: i32) -> (i32, i32) {
    %c0_i32 = arith.constant 0 : i32
    %c0_i32_0 = arith.constant 0 : i32
    %c0_i32_1 = arith.constant 0 : i32
    return %c0_i32, %c0_i32_0 : i32, i32
  }
  func.func @transform_3(%arg0: i32) -> (i32, i32) {
    %c0_i32 = arith.constant 0 : i32
    %c0_i32_0 = arith.constant 0 : i32
    %c0_i32_1 = arith.constant 0 : i32
    return %c0_i32, %c0_i32_0 : i32, i32
  }
  func.func @transform_4(%arg0: i32) -> (i32, i32) {
    %c0_i32 = arith.constant 0 : i32
    %c0_i32_0 = arith.constant 0 : i32
    %c0_i32_1 = arith.constant 0 : i32
    return %c0_i32, %c0_i32_0 : i32, i32
  }
  func.func @transform_5(%arg0: i32) -> (i32, i32) {
    %c0_i32 = arith.constant 0 : i32
    %c0_i32_0 = arith.constant 0 : i32
    return %arg0, %c0_i32 : i32, i32
  }
}

</mosaic_0001>

<bundles_post_ra>
// kernel: tuple_returning_net.1
= control target key start
LH: loop header
LB: loop body
LE: loop exit
PB: predicated region body
PF: predicated region fallthrough
CT: control target
= control target key end

     0   :  { %s252_s1 = inlined_call_operand.vmem [shape: f32[128,128], index: 1, kind: input, shape index: {}]   ;;  %s253_s3 = inlined_call_operand.vmem [shape: f32[128,128], index: 3, kind: input, shape index: {}]   ;;  %s254_s2 = inlined_call_operand.vmem [shape: f32[1,128], index: 2, kind: input, shape index: {}]   ;;  %s255_s0 = inlined_call_operand.vmem [shape: f32[8,128], index: 0, kind: input, shape index: {}]   ;;  %s256_s4 = inlined_call_operand.vmem [shape: f32[1,128], index: 4, kind: input, shape index: {}]   ;;  %s257_s5 = inlined_call_operand.vmem [shape: f32[8,256], index: 5, kind: output, shape index: {}]  }
   0x1   :  { %v36_v0 = vld [vmem:[%s252_s1 + $0x78] sm:$0xff]  ;;  %v35_v1 = vld [vmem:[%s252_s1 + $0x70] sm:$0xff]  ;;  %v34_v2 = vld [vmem:[%s252_s1 + $0x68] sm:$0xff] }
   0x2   :  { %41 = vmatpush.msra.mxu0 %v36_v0  ;;  %v33_v3 = vld [vmem:[%s252_s1 + $0x60] sm:$0xff]  ;;  %v77_v4 = vld [vmem:[%s253_s3 + $0x78] sm:$0xff]  ;;  %v76_v6 = vld [vmem:[%s253_s3 + $0x70] sm:$0xff] }
   0x3   :  { %v32_v5 = vld [vmem:[%s252_s1 + $0x58] sm:$0xff]  ;;  %82 = vmatpush.msra.mxu1 %v77_v4  ;;  %v75_v7 = vld [vmem:[%s253_s3 + $0x68] sm:$0xff]  ;;  %v31_v8 = vld [vmem:[%s252_s1 + $0x50] sm:$0xff] }
   0x4   :  { %42 = vmatpush.msra.mxu0 %v35_v1  ;;  %v74_v9 = vld [vmem:[%s253_s3 + $0x60] sm:$0xff]  ;;  %v30_v10 = vld [vmem:[%s252_s1 + $0x48] sm:$0xff]  ;;  %v73_v11 = vld [vmem:[%s253_s3 + $0x58] sm:$0xff] }
   0x5   :  { %83 = vmatpush.msra.mxu1 %v76_v6  ;;  %v29_v12 = vld [vmem:[%s252_s1 + $0x40] sm:$0xff]  ;;  %v72_v13 = vld [vmem:[%s253_s3 + $0x50] sm:$0xff]  ;;  %v28_v14 = vld [vmem:[%s252_s1 + $0x38] sm:$0xff] }
   0x6   :  { %43 = vmatpush.msra.mxu0 %v34_v2  ;;  %v71_v15 = vld [vmem:[%s253_s3 + $0x48] sm:$0xff]  ;;  %v27_v16 = vld [vmem:[%s252_s1 + $0x30] sm:$0xff]  ;;  %v70_v17 = vld [vmem:[%s253_s3 + $0x40] sm:$0xff] }
   0x7   :  { %84 = vmatpush.msra.mxu1 %v75_v7  ;;  %v26_v18 = vld [vmem:[%s252_s1 + $0x28] sm:$0xff]  ;;  %v69_v19 = vld [vmem:[%s253_s3 + $0x38] sm:$0xff]  ;;  %v25_v20 = vld [vmem:[%s252_s1 + $0x20] sm:$0xff] }
   0x8   :  { %44 = vmatpush.msra.mxu0 %v33_v3  ;;  %v68_v21 = vld [vmem:[%s253_s3 + $0x30] sm:$0xff]  ;;  %v24_v22 = vld [vmem:[%s252_s1 + $0x18] sm:$0xff]  ;;  %v67_v23 = vld [vmem:[%s253_s3 + $0x28] sm:$0xff] }
   0x9   :  { %85 = vmatpush.msra.mxu1 %v74_v9  ;;  %v23_v24 = vld [vmem:[%s252_s1 + $0x10] sm:$0xff]  ;;  %v66_v25 = vld [vmem:[%s253_s3 + $0x20] sm:$0xff]  ;;  %v22_v26 = vld [vmem:[%s252_s1 + $0x8] sm:$0xff] }
   0xa   :  { %45 = vmatpush.msra.mxu0 %v32_v5  ;;  %v65_v27 = vld [vmem:[%s253_s3 + $0x18] sm:$0xff]  ;;  %v21_v28 = vld [vmem:[%s252_s1] sm:$0xff]  ;;  %v64_v30 = vld [vmem:[%s253_s3 + $0x10] sm:$0xff] }
   0xb   :  { %86 = vmatpush.msra.mxu1 %v73_v11  ;;  %v20_v29 = vld [vmem:[%s255_s0] sm:$0xff]  ;;  %v63_v31 = vld [vmem:[%s253_s3 + $0x8] sm:$0xff] }
   0xc   :  { %46 = vmatpush.msra.mxu0 %v31_v8  ;;  %v62_v32 = vld [vmem:[%s253_s3] sm:$0xff] }
   0xd   :  { %87 = vmatpush.msra.mxu1 %v72_v13  ;;  %v109_v33 = vld [vmem:[%s254_s2] ss:$0 sm:$0xff] }
   0xe   :  { %47 = vmatpush.msra.mxu0 %v30_v10  ;;  %v110_v37 = vld [vmem:[%s256_s4] ss:$0 sm:$0xff] }
   0xf   :  { %88 = vmatpush.msra.mxu1 %v71_v15 }
  0x10   :  { %48 = vmatpush.msra.mxu0 %v29_v12 }
  0x11   :  { %89 = vmatpush.msra.mxu1 %v70_v17 }
  0x12   :  { %49 = vmatpush.msra.mxu0 %v28_v14 }
  0x13   :  { %90 = vmatpush.msra.mxu1 %v69_v19 }
  0x14   :  { %50 = vmatpush.msra.mxu0 %v27_v16 }
  0x15   :  { %91 = vmatpush.msra.mxu1 %v68_v21 }
  0x16   :  { %51 = vmatpush.msra.mxu0 %v26_v18 }
  0x17   :  { %92 = vmatpush.msra.mxu1 %v67_v23 }
  0x18   :  { %52 = vmatpush.msra.mxu0 %v25_v20 }
  0x19   :  { %93 = vmatpush.msra.mxu1 %v66_v25 }
  0x1a   :  { %53 = vmatpush.msra.mxu0 %v24_v22 }
  0x1b   :  { %94 = vmatpush.msra.mxu1 %v65_v27 }
  0x1c   :  { %54 = vmatpush.msra.mxu0 %v23_v24 }
  0x1d   :  { %95 = vmatpush.msra.mxu1 %v64_v30 }
  0x1e   :  { %55 = vmatpush.msra.mxu0 %v22_v26 }
  0x1f   :  { %96 = vmatpush.msra.mxu1 %v63_v31 }
  0x20   :  { %56 = vmatpush.msra.mxu0 %v21_v28 }
  0x21   :  { %57 = vmatmul.f32.vlgmr.msra.gmra.mxu0 %v20_v29  ;;  %97 = vmatpush.msra.mxu1 %v62_v32 }
  0x9e   :  { %v58_v34 = vpop.f32.mrf.mxu0 }
  0x9f   :  { %v59_v35 = vadd.f32 %v109_v33, %v58_v34 }
  0xa1   :  { %v61_v36 = vmax.f32 %v59_v35, 0.0 }
  0xa3   :  { %98 = vmatmul.f32.vlgmr.msra.gmra.mxu1 %v61_v36 }
 0x120   :  { %v99_v38 = vpop.f32.mrf.mxu1 }
 0x121   :  { %v100_v39 = vadd.f32 %v110_v37, %v99_v38 }
 0x123   :  { %v102_v40 = vmul.f32 2.0, %v100_v39  ;;  %103 = vst [vmem:[%s257_s5] sm:$0xff] %v100_v39 }
 0x125   :  { %104 = vst [vmem:[%s257_s5 + $0x8] sm:$0xff] %v102_v40 }

</bundles_post_ra>
